<compile_context>
chip_gen: v7x
topology: tpu7x:2x2x1
jax: 0.10.0
libtpu: 0.0.40
codegen_flags: <defaults>
</compile_context>

<pallas_src>
import jax
import jax.numpy as jnp
from jax.experimental import pallas as pl
from jax.experimental.pallas import tpu as pltpu


def _focus_conv1x1_kernel(w_ref, b_ref, x_ref, o_ref):
    # w_ref: (Cout, K)   resident weight
    # b_ref: (Cout, 1)   resident bias column (f32)
    # x_ref: (K, TM)     activation tile: channels on sublanes, pixels on lanes
    # o_ref: (Cout, TM)  output tile (lane-dense store)
    #
    # NOTE on partial tail M-blocks: their padding lanes of x_ref hold
    # arbitrary data.  This is safe only because every output column depends
    # solely on its own input column (the reduction is over K / sublanes) and
    # the tail columns are masked on store.  Do not add any cross-lane
    # reduction here without also masking the padding lanes.
    acc = jnp.dot(w_ref[...], x_ref[...], preferred_element_type=jnp.float32)
    o_ref[...] = (acc + b_ref[...]).astype(o_ref.dtype)


def focus_forward(x, weight, bias, *, compute_dtype=None, tile_m=None):
    """YOLOv5 Focus forward pass.

    x:      (N, Cin, H, W)  NCHW (PyTorch convention), H and W must be even
    weight: (Cout, 4*Cin)   1x1 conv weight with the kernel dims squeezed
    bias:   (Cout,)
    compute_dtype: optional dtype for the MXU operands (e.g. jnp.bfloat16);
        the cast fuses into the space-to-depth pass, while accumulation, bias
        add and the output stay float32-accurate.
    tile_m: optional lane-tile override (multiple of 128) — mainly to exercise
        the multi-tile / partial-tail path on small shapes.
    returns (N, Cout, H//2, W//2) in x.dtype
    """
    n, cin, h, w = x.shape
    cout, k = weight.shape
    assert k == 4 * cin, (k, cin)
    assert h % 2 == 0 and w % 2 == 0, "Focus requires even H and W"
    ho, wo = h // 2, w // 2
    m = ho * wo
    out_dtype = x.dtype

    # Space-to-depth as a single (fused) reshape + transpose.  Resulting
    # channel index is wp*(2*Cin) + hp*Cin + c, matching
    # torch.cat((x[...,::2,::2], x[...,1::2,::2],
    #            x[...,::2,1::2], x[...,1::2,1::2]), dim=1).
    x6 = x.reshape(n, cin, ho, 2, wo, 2)  # (n, c, ho, hp, wo, wp)

    wmat = weight if compute_dtype is None else weight.astype(compute_dtype)
    bcol = bias.reshape(cout, 1).astype(jnp.float32)

    vmem_limit = 32 * 1024 * 1024  # explicit guardrail (v5e default is 16 MiB)

    if m < 128:
        # --- Small-image path: fold batch into the lane dimension so the
        # output last dim is >= 128 whenever possible (lane-dense stores).
        xk = jnp.transpose(x6, (5, 3, 1, 0, 2, 4)).reshape(k, n * m)
        if compute_dtype is not None:
            xk = xk.astype(compute_dtype)
        nm = n * m

        out = pl.pallas_call(
            _focus_conv1x1_kernel,
            out_shape=jax.ShapeDtypeStruct((cout, nm), out_dtype),
            grid_spec=pltpu.PrefetchScalarGridSpec(
                num_scalar_prefetch=0,
                grid=(1,),
                in_specs=[
                    pl.BlockSpec((cout, k), lambda i: (0, 0)),
                    pl.BlockSpec((cout, 1), lambda i: (0, 0)),
                    pl.BlockSpec((k, nm), lambda i: (0, 0)),
                ],
                out_specs=pl.BlockSpec((cout, nm), lambda i: (0, 0)),
            ),
            compiler_params=pltpu.CompilerParams(
                dimension_semantics=("arbitrary",),
                allow_input_fusion=[False, False, True],
                vmem_limit_bytes=vmem_limit,
            ),
        )(wmat, bcol, xk)
        # (Cout, N*Ho*Wo) -> (N, Cout, Ho, Wo); tiny arrays, transpose is noise.
        return jnp.transpose(out.reshape(cout, n, ho, wo), (1, 0, 2, 3))

    # --- General path: per-batch (K, M) activations, big lane tiles.
    xk = jnp.transpose(x6, (0, 5, 3, 1, 2, 4)).reshape(n, k, m)
    if compute_dtype is not None:
        xk = xk.astype(compute_dtype)

    if tile_m is None:
        # Big lane tile (multiple of 512, up to 32768) so the per-grid-step
        # overhead is amortized; cap by a conservative double-buffered VMEM
        # budget.  Matters most on v7x (3.2 TB/s HBM makes each DMA shortest).
        bytes_per_lane = k * xk.dtype.itemsize + cout * out_dtype.itemsize
        tm = (10 * 1024 * 1024) // (2 * bytes_per_lane)
        tm = max(512, min(32768, (tm // 512) * 512))
        if m <= tm:
            tm = m
    else:
        assert tile_m == m or tile_m % 128 == 0, tile_m
        tm = min(tile_m, m)

    # m-tile axis first so megacore sharding works even for n == 1.
    grid = (pl.cdiv(m, tm), n)

    out = pl.pallas_call(
        _focus_conv1x1_kernel,
        out_shape=jax.ShapeDtypeStruct((n, cout, m), out_dtype),
        grid_spec=pltpu.PrefetchScalarGridSpec(
            num_scalar_prefetch=0,
            grid=grid,
            in_specs=[
                pl.BlockSpec((cout, k), lambda i, b: (0, 0)),          # weight (resident)
                pl.BlockSpec((cout, 1), lambda i, b: (0, 0)),          # bias   (resident)
                pl.BlockSpec((None, k, tm), lambda i, b: (b, 0, i)),   # activations
            ],
            out_specs=pl.BlockSpec((None, cout, tm), lambda i, b: (b, 0, i)),
        ),
        compiler_params=pltpu.CompilerParams(
            dimension_semantics=("parallel", "parallel"),
            allow_input_fusion=[False, False, True],
            vmem_limit_bytes=vmem_limit,
        ),
    )(wmat, bcol, xk)

    # (n, Cout, Ho*Wo) is already NCHW order — just unfold the spatial dim.
    return out.reshape(n, cout, ho, wo)


def _reference(x, weight, bias):
    # Plain-JAX reference using the original strided-slice + concat formulation.
    cat = jnp.concatenate(
        (x[..., ::2, ::2], x[..., 1::2, ::2], x[..., ::2, 1::2], x[..., 1::2, 1::2]),
        axis=1,
    )
    return jnp.einsum("nchw,oc->nohw", cat, weight) + bias[None, :, None, None]


if __name__ == "__main__":
    key = jax.random.PRNGKey(0)
    kx, kw, kb, kx2 = jax.random.split(key, 4)

    # Primary small shapes consistent with the module: batch=2, inchannel=4, H=W=16.
    N, CIN, H, W = 2, 4, 16, 16
    COUT = 8
    K = 4 * CIN

    x = jax.random.normal(kx, (N, CIN, H, W), dtype=jnp.float32)
    weight = jax.random.normal(kw, (COUT, K), dtype=jnp.float32) * 0.1
    bias = jax.random.normal(kb, (COUT,), dtype=jnp.float32) * 0.1

    # 1) Primary shape: Ho*Wo = 64 < 128 -> batch folded into lanes (lane dim 128).
    out = jax.block_until_ready(focus_forward(x, weight, bias))
    ref = _reference(x, weight, bias)
    assert out.shape == (N, COUT, H // 2, W // 2), out.shape
    assert jnp.allclose(out, ref, atol=1e-4, rtol=1e-4), "mismatch (16x16, f32)"

    # 2) Larger spatial extent on the tiled path (Ho*Wo = 576).
    H2 = W2 = 48
    x2 = jax.random.normal(kx2, (N, CIN, H2, W2), dtype=jnp.float32)
    ref2 = _reference(x2, weight, bias)
    out2 = jax.block_until_ready(focus_forward(x2, weight, bias))
    assert out2.shape == (N, COUT, H2 // 2, W2 // 2), out2.shape
    assert jnp.allclose(out2, ref2, atol=1e-4, rtol=1e-4), "mismatch (48x48, f32)"

    # 2b) Force several m-tiles plus a partial tail (576 = 2*256 + 64) to
    #     exercise the cdiv grid / masked-writeback path.
    out2t = jax.block_until_ready(focus_forward(x2, weight, bias, tile_m=256))
    assert jnp.allclose(out2t, ref2, atol=1e-4, rtol=1e-4), "mismatch (48x48, tiled)"

    # 3) bf16 MXU-operand path (f32 accumulate), looser tolerance.
    out2b = jax.block_until_ready(
        focus_forward(x2, weight, bias, compute_dtype=jnp.bfloat16))
    assert jnp.allclose(out2b, ref2, atol=2e-2, rtol=2e-2), "mismatch (48x48, bf16)"

    print("KERNEL_OK")
</pallas_src>

<mosaic_0001>
module attributes {stable_mosaic.version = 11 : i64} {
  func.func @_focus_conv1x1_kernel(%arg0: i32, %arg1: memref<8x16xf32, #tpu.memory_space<vmem>>, %arg2: memref<8x1xf32, #tpu.memory_space<vmem>>, %arg3: memref<16x128xf32, #tpu.memory_space<vmem>>, %arg4: memref<8x128xf32, #tpu.memory_space<vmem>>) attributes {dimension_semantics = [#tpu.dimension_semantics<arbitrary>], iteration_bounds = array<i64: 1>, scalar_prefetch = 0 : i64, scratch_operands = 0 : i64, tpu.core_type = #tpu.core_type<tc>, window_params = [{pipeline_mode = #tpu.pipeline_mode<synchronous>, transform_indices = @transform_0, window_bounds = array<i64: 8, 16>}, {pipeline_mode = #tpu.pipeline_mode<synchronous>, transform_indices = @transform_1, window_bounds = array<i64: 8, 1>}, {pipeline_mode = #tpu.pipeline_mode<synchronous>, transform_indices = @transform_2, window_bounds = array<i64: 16, 128>}, {pipeline_mode = #tpu.pipeline_mode<synchronous>, transform_indices = @transform_3, window_bounds = array<i64: 8, 128>}]} {
    %c0 = arith.constant 0 : index
    %c0_0 = arith.constant 0 : index
    %0 = vector.load %arg1[%c0, %c0_0] : memref<8x16xf32, #tpu.memory_space<vmem>>, vector<8x16xf32>
    %c0_1 = arith.constant 0 : index
    %c0_2 = arith.constant 0 : index
    %1 = vector.load %arg3[%c0_1, %c0_2] : memref<16x128xf32, #tpu.memory_space<vmem>>, vector<16x128xf32>
    %cst = arith.constant dense<0.000000e+00> : vector<8x128xf32>
    %2 = tpu.matmul %0, %1, %cst {dimension_numbers = #tpu.dot_dimension_numbers<[1], [0], [0], [1], [0, 0, 1, 1], [], []>} : vector<8x16xf32>, vector<16x128xf32>, vector<8x128xf32> -> vector<8x128xf32>
    %c0_3 = arith.constant 0 : index
    %c0_4 = arith.constant 0 : index
    %3 = vector.load %arg2[%c0_3, %c0_4] : memref<8x1xf32, #tpu.memory_space<vmem>>, vector<8x1xf32>
    %4 = vector.broadcast %3 : vector<8x1xf32> to vector<8x128xf32>
    %5 = arith.addf %2, %4 : vector<8x128xf32>
    %c0_5 = arith.constant 0 : index
    %c0_6 = arith.constant 0 : index
    %6 = vector.load %arg4[%c0_5, %c0_6] : memref<8x128xf32, #tpu.memory_space<vmem>>, vector<8x128xf32>
    tpu.vector_store %arg4[%c0_5, %c0_6], %5 {strides = array<i32>} : memref<8x128xf32, #tpu.memory_space<vmem>>, vector<8x128xf32>,
    return
  }
  func.func @transform_0(%arg0: i32) -> (i32, i32) {
    %c0_i32 = arith.constant 0 : i32
    %c0_i32_0 = arith.constant 0 : i32
    %c0_i32_1 = arith.constant 0 : i32
    return %c0_i32, %c0_i32_0 : i32, i32
  }
  func.func @transform_1(%arg0: i32) -> (i32, i32) {
    %c0_i32 = arith.constant 0 : i32
    %c0_i32_0 = arith.constant 0 : i32
    %c0_i32_1 = arith.constant 0 : i32
    return %c0_i32, %c0_i32_0 : i32, i32
  }
  func.func @transform_2(%arg0: i32) -> (i32, i32) {
    %c0_i32 = arith.constant 0 : i32
    %c0_i32_0 = arith.constant 0 : i32
    %c0_i32_1 = arith.constant 0 : i32
    return %c0_i32, %c0_i32_0 : i32, i32
  }
  func.func @transform_3(%arg0: i32) -> (i32, i32) {
    %c0_i32 = arith.constant 0 : i32
    %c0_i32_0 = arith.constant 0 : i32
    %c0_i32_1 = arith.constant 0 : i32
    return %c0_i32, %c0_i32_0 : i32, i32
  }
}

</mosaic_0001>

<bundles_post_ra>
// kernel: tpu_custom_call.1
= control target key start
LH: loop header
LB: loop body
LE: loop exit
PB: predicated region body
PF: predicated region fallthrough
CT: control target
= control target key end

     0   :  { %8 = vsyncpa [#allocation3], 0  ;;  %s254_s0 = inlined_call_operand.hbm [shape: f32[8,16], index: 0, kind: input, shape index: {}]   ;;  %s255_s1 = inlined_call_operand.vmem [shape: f32[8,1], index: 1, kind: input, shape index: {}]   ;;  %s256_s2 = inlined_call_operand.vmem [shape: f32[16,128], index: 2, kind: input, shape index: {}]   ;;  %s257_s3 = inlined_call_operand.hbm [shape: f32[8,128], index: 3, kind: output, shape index: {}]  }
   0x1   :  { %9 = vsyncpa [#allocation4], 0  ;;  %s195_s12 = smov [#allocation2]   ;;  %s147_s16 = scalar_lea.hbm %s254_s0, 128 }
   0x2   :  { %s16_s13 = sshll.u32 %s195_s12, 4  ;;  %p148_p0 = scmp.ne.s32.totalorder %s254_s0, %s147_s16  ;;  %s17_s13 = int_to_ptr.vmem [resolvable:$true] %s16_s13 }
   0x3   :  { %p151_p1 = scmp.lt.u32.totalorder %s147_s16, %s254_s0 }
   0x5   :  { %p153_p2 = pnand %p151_p1, %p148_p0 }
   0x7   :  { %156 = shalt.err (!%p153_p2)
}
   0x8   :  { %s157_s21 = scalar_lea.vmem %s17_s13, 128  ;;  %p162_p4 = scmp.lt.s32.totalorder %s17_s13, %s17_s13 }
   0x9   :  { %p158_p3 = scmp.ne.s32.totalorder %s17_s13, %s157_s21  ;;  %p163_p5 = scmp.lt.s32.totalorder %s157_s21, %s157_s21 }
   0xb   :  { %p164_p6 = por %p163_p5, %p162_p4 }
   0xd   :  { %p165_p7 = pnand %p164_p6, %p158_p3 }
   0xf   :  { %168 = shalt.err (!%p165_p7)
}
  0x10   :  { %19 = dma.hbm_to_vmem [thread:$0]  %s254_s0, 128, %s17_s13, [#allocation3]  }
  0x11   :  { %191 = dma.done.wait [#allocation3], 128  }
  0x12   :  { %192 = vsyncadd [#allocation3], 4294967168  ;;  %v196_v0 = vmov 0.0|0.0   ;;  %vm197_vm0 = vmmov 0   ;;  %v198_v1 = vmov 0.0   ;;  %v199_v2 = vmov 0  }
  0x13   :  { %137 = vmatprep.subr.bf16.mxu0 %v196_v0  ;;  %134 = vmatprep.mubr.msk.f32.mxu0 %vm197_vm0, %v198_v1  ;;  %v28_v3 = vld [vmem:[%s256_s2] sm:$0xff]  ;;  %v29_v4 = vld [vmem:[%s256_s2 + $0x8] sm:$0xff]  ;;  %vm36_vm1 = vcmask 130048   ;;  %s200_s29 = smov [#allocation5]  }
  0x14   :  { %146 = vset.pattern.permute.xlu0 %v199_v2  ;;  %v138_v5 = vpack.c.bf16 %v29_v4, %v28_v3  ;;  %v30_v6 = vld [vmem:[%s255_s1] sm:$0xff]  ;;  %s117_s30 = sshll.u32 %s200_s29, 4  ;;  %s118_s30 = int_to_ptr.vmem [resolvable:$true] %s117_s30 }
  0x15   :  { %33 = vperm.xlu0 %146, %v30_v6   ;;  %v27_v7 = vld [vmem:[#allocation2] sm:$0xff]  ;;  %s169_s4 = scalar_lea.vmem %s118_s30, 128  ;;  %p174_p9 = scmp.lt.s32.totalorder %s118_s30, %s118_s30 }
  0x16   :  { %139 = vmatpush3.bf16.msra.mxu0 %v138_v5  ;;  %p170_p8 = scmp.ne.s32.totalorder %s118_s30, %s169_s4  ;;  %p175_p10 = scmp.lt.s32.totalorder %s169_s4, %s169_s4 }
  0x18   :  { %p176_p11 = por %p175_p10, %p174_p9 }
  0x19   :  { %135 = vmatmul.mubr.msk.f32.vlgmr.msra.gmra.mrb[0].mxu0 %vm36_vm1, %v27_v7 }
  0x1a   :  { %p177_p12 = pnand %p176_p11, %p170_p8 }
  0x94   :  { %v34_v8 = vpop.permute.xlu0 %33 }
  0xec   :  { %v106_v9 = vpop.f32.mrb[0].mxu0 }
  0xed   :  { %v107_v10 = vadd.f32 %v106_v9, %v34_v8  ;;  %v136_v11 = vpop.f32.mrb[1].mxu0 }
  0xef   :  { %110 = vst [vmem:[#allocation5] sm:$0xff] %v107_v10 }
  0xf0   :  { %180 = shalt.err (!%p177_p12)
}
  0xf1   :  { %s181_s5 = scalar_lea.hbm %s257_s3, 128 }
  0xf2   :  { %p182_p13 = scmp.ne.s32.totalorder %s257_s3, %s181_s5  ;;  %p185_p0 = scmp.lt.u32.totalorder %s181_s5, %s257_s3 }
  0xf4   :  { %p187_p1 = pnand %p185_p0, %p182_p13 }
  0xf6   :  { %190 = shalt.err (!%p187_p1)
}
  0xf7   :  { %120 = dma.vmem_to_hbm [thread:$0]  %s118_s30, 128, %s257_s3, [#allocation4]  }
  0xf8   :  { %193 = dma.done.wait [#allocation4], 128  }
  0xf9   :  { %194 = vsyncadd [#allocation4], 4294967168 }
  0xfa   :  { %124 = vsyncpa [#allocation3], 1 }
  0xfb   :  { %125 = vsyncpa [#allocation4], 1 }

</bundles_post_ra>
